<compile_context>
chip_gen: v7x
topology: tpu7x:2x2x1
jax: 0.10.0
libtpu: 0.0.40
codegen_flags: <defaults>
</compile_context>

<pallas_src>
import jax
import jax.numpy as jnp
from jax.experimental import pallas as pl
from jax.experimental.pallas import tpu as pltpu

HIDDEN = 64


def _round_up(n, m):
    return ((n + m - 1) // m) * m


def _policy_kernel(x_ref, w1_ref, b1_ref, w2_ref, b2_ref, w3_ref, b3_ref, mu_ref):
    # Cast x to the weights' dtype on vregs (no-op for f32); f32 accumulation.
    x = x_ref[...].astype(w1_ref.dtype)
    # Layer 1: ReLU(x @ W1 + b1)
    h = jnp.dot(x, w1_ref[...], preferred_element_type=jnp.float32)
    h = jnp.maximum(h + b1_ref[...], 0.0)
    # Layer 2: ReLU(h @ W2 + b2)
    h = jnp.dot(h.astype(w2_ref.dtype), w2_ref[...], preferred_element_type=jnp.float32)
    h = jnp.maximum(h + b2_ref[...], 0.0)
    # mu head (natural act_dim width; last dim == full array dim so the
    # narrow store is legal -- masked vst, but 16x less HBM writeback).
    mu = jnp.dot(h.astype(w3_ref.dtype), w3_ref[...], preferred_element_type=jnp.float32)
    mu_ref[...] = (mu + b3_ref[...]).astype(mu_ref.dtype)


def gaussian_policy_forward(x, params, *, block_batch=2048, matmul_dtype=jnp.float32):
    """Returns (mu, std) exactly like GaussianPolicy.forward.

    x: [B, obs_dim] f32 -> mu: [B, act_dim] f32, std: [act_dim] f32.

    block_batch: max batch tile (rows per grid step, multiple of 8).  Per-step
    VMEM is only ~1.1 KB/row double-buffered, so even tb=8192 uses a few MB of
    the 16/32 MiB scoped VMEM default (v5e/v6e+v7x); no vmem_limit_bytes needed.
    matmul_dtype: f32 (default, matches the PyTorch module) or bf16 for MXU-
    native operands; elementwise bias/ReLU always run in f32.
    """
    w1, b1, w2, b2, w3, b3, log_std = params
    batch, obs_dim = x.shape
    hidden = w1.shape[1]
    act_dim = w3.shape[1]

    # std depends only on parameters -> plain JAX, not in the per-batch kernel.
    std = jnp.exp(log_std)

    # ---- batch tiling: multiple of 8, >=2 grid steps when possible (v7x) ---
    padded8 = _round_up(batch, 8)
    tb_cap = max(8, _round_up(block_batch, 8))
    if padded8 >= 16:
        tb = min(tb_cap, _round_up(padded8 // 2, 8))
    else:
        tb = 8
    padded_b = _round_up(batch, tb)

    # Ragged batch: zero-pad rows (keeps tail rows well-defined); sliced off
    # below.  x stays f32 -- the cast to matmul_dtype happens inside the kernel.
    x_p = x if padded_b == batch else jnp.pad(x, ((0, padded_b - batch), (0, 0)))

    w1_c = w1.astype(matmul_dtype)
    w2_c = w2.astype(matmul_dtype)
    w3_c = w3.astype(matmul_dtype)
    b1_2d = b1.reshape(1, hidden).astype(jnp.float32)
    b2_2d = b2.reshape(1, hidden).astype(jnp.float32)
    b3_2d = b3.reshape(1, act_dim).astype(jnp.float32)

    grid = (padded_b // tb,)

    # Accurate cost hint: real head width, real dtypes.
    flops = 2 * padded_b * (obs_dim * hidden + hidden * hidden + hidden * act_dim)
    bytes_accessed = (
        x_p.size * x_p.dtype.itemsize
        + padded_b * act_dim * 4
        + w1_c.size * w1_c.dtype.itemsize
        + w2_c.size * w2_c.dtype.itemsize
        + w3_c.size * w3_c.dtype.itemsize
        + (b1_2d.size + b2_2d.size + b3_2d.size) * 4
    )

    mu_padded = pl.pallas_call(
        _policy_kernel,
        out_shape=jax.ShapeDtypeStruct((padded_b, act_dim), jnp.float32),
        grid=grid,
        in_specs=[
            pl.BlockSpec((tb, obs_dim), lambda i: (i, 0)),      # x tile (pipelined)
            pl.BlockSpec((obs_dim, hidden), lambda i: (0, 0)),  # W1 (VMEM-resident)
            pl.BlockSpec((1, hidden), lambda i: (0, 0)),        # b1
            pl.BlockSpec((hidden, hidden), lambda i: (0, 0)),   # W2
            pl.BlockSpec((1, hidden), lambda i: (0, 0)),        # b2
            pl.BlockSpec((hidden, act_dim), lambda i: (0, 0)),  # W3
            pl.BlockSpec((1, act_dim), lambda i: (0, 0)),       # b3
        ],
        out_specs=pl.BlockSpec((tb, act_dim), lambda i: (i, 0)),
        compiler_params=pltpu.CompilerParams(
            dimension_semantics=("parallel",),
        ),
        cost_estimate=pl.CostEstimate(
            flops=flops, transcendentals=0, bytes_accessed=bytes_accessed),
    )(x_p, w1_c, b1_2d, w2_c, b2_2d, w3_c, b3_2d)

    mu = mu_padded if padded_b == batch else mu_padded[:batch]
    return mu, std


def init_params(key, obs_dim, act_dim):
    """Deterministic init matching nn.Linear's default U(-1/sqrt(fan_in), +)."""
    ks = jax.random.split(key, 6)

    def linear(kw, kb, fan_in, fan_out):
        bound = 1.0 / jnp.sqrt(fan_in)
        w = jax.random.uniform(kw, (fan_in, fan_out), jnp.float32, -bound, bound)
        b = jax.random.uniform(kb, (fan_out,), jnp.float32, -bound, bound)
        return w, b

    w1, b1 = linear(ks[0], ks[1], obs_dim, HIDDEN)
    w2, b2 = linear(ks[2], ks[3], HIDDEN, HIDDEN)
    w3, b3 = linear(ks[4], ks[5], HIDDEN, act_dim)
    log_std = jnp.zeros((act_dim,), jnp.float32)  # nn.Parameter(torch.zeros(act_dim))
    return (w1, b1, w2, b2, w3, b3, log_std)


def _reference_forward(x, params, matmul_dtype=jnp.float32):
    w1, b1, w2, b2, w3, b3, log_std = params
    h = jnp.maximum(jnp.dot(x.astype(matmul_dtype), w1.astype(matmul_dtype),
                            preferred_element_type=jnp.float32) + b1, 0.0)
    h = jnp.maximum(jnp.dot(h.astype(matmul_dtype), w2.astype(matmul_dtype),
                            preferred_element_type=jnp.float32) + b2, 0.0)
    mu = jnp.dot(h.astype(matmul_dtype), w3.astype(matmul_dtype),
                 preferred_element_type=jnp.float32) + b3
    return mu, jnp.exp(log_std)


if __name__ == "__main__":
    obs_dim, act_dim, batch = 16, 8, 4
    key = jax.random.PRNGKey(0)
    k_params, k_x, k_x2 = jax.random.split(key, 3)

    params = init_params(k_params, obs_dim, act_dim)

    # Small batch (single grid step, batch padded 4 -> 8), default f32 matmuls.
    x = jax.random.normal(k_x, (batch, obs_dim), jnp.float32)
    mu, std = jax.block_until_ready(gaussian_policy_forward(x, params))

    mu_ref_f32, std_ref = _reference_forward(x, params, matmul_dtype=jnp.float32)
    assert mu.shape == (batch, act_dim) and std.shape == (act_dim,)
    assert jnp.allclose(mu, mu_ref_f32, atol=1e-5, rtol=1e-5)
    assert jnp.allclose(std, std_ref, atol=1e-6, rtol=1e-6)

    # Larger batch exercising a multi-step grid (>=2 steps) + ragged last tile.
    x2 = jax.random.normal(k_x2, (300, obs_dim), jnp.float32)
    mu2, std2 = jax.block_until_ready(
        gaussian_policy_forward(x2, params, block_batch=128))
    mu2_ref, _ = _reference_forward(x2, params, matmul_dtype=jnp.float32)
    assert mu2.shape == (300, act_dim)
    assert jnp.allclose(mu2, mu2_ref, atol=1e-5, rtol=1e-5)

    # Optional bf16-operand path (explicit precision trade-off).
    mu3, _ = jax.block_until_ready(
        gaussian_policy_forward(x2, params, matmul_dtype=jnp.bfloat16))
    mu3_ref, _ = _reference_forward(x2, params, matmul_dtype=jnp.bfloat16)
    assert jnp.allclose(mu3, mu3_ref, atol=1e-3, rtol=1e-3)

    print("KERNEL_OK")
</pallas_src>

<mosaic_0001>
module attributes {stable_mosaic.version = 11 : i64} {
  func.func @_policy_kernel(%arg0: i32, %arg1: memref<8x16xf32, #tpu.memory_space<vmem>>, %arg2: memref<16x64xf32, #tpu.memory_space<vmem>>, %arg3: memref<1x64xf32, #tpu.memory_space<vmem>>, %arg4: memref<64x64xf32, #tpu.memory_space<vmem>>, %arg5: memref<1x64xf32, #tpu.memory_space<vmem>>, %arg6: memref<64x8xf32, #tpu.memory_space<vmem>>, %arg7: memref<1x8xf32, #tpu.memory_space<vmem>>, %arg8: memref<8x8xf32, #tpu.memory_space<vmem>>) attributes {dimension_semantics = [#tpu.dimension_semantics<parallel>], iteration_bounds = array<i64: 1>, scalar_prefetch = 0 : i64, scratch_operands = 0 : i64, tpu.core_type = #tpu.core_type<tc>, window_params = [{transform_indices = @transform_0, window_bounds = array<i64: 8, 16>}, {pipeline_mode = #tpu.pipeline_mode<synchronous>, transform_indices = @transform_1, window_bounds = array<i64: 16, 64>}, {pipeline_mode = #tpu.pipeline_mode<synchronous>, transform_indices = @transform_2, window_bounds = array<i64: 1, 64>}, {pipeline_mode = #tpu.pipeline_mode<synchronous>, transform_indices = @transform_3, window_bounds = array<i64: 64, 64>}, {pipeline_mode = #tpu.pipeline_mode<synchronous>, transform_indices = @transform_4, window_bounds = array<i64: 1, 64>}, {pipeline_mode = #tpu.pipeline_mode<synchronous>, transform_indices = @transform_5, window_bounds = array<i64: 64, 8>}, {pipeline_mode = #tpu.pipeline_mode<synchronous>, transform_indices = @transform_6, window_bounds = array<i64: 1, 8>}, {transform_indices = @transform_7, window_bounds = array<i64: 8, 8>}]} {
    %c0 = arith.constant 0 : index
    %c0_0 = arith.constant 0 : index
    %0 = vector.load %arg1[%c0, %c0_0] : memref<8x16xf32, #tpu.memory_space<vmem>>, vector<8x16xf32>
    %c0_1 = arith.constant 0 : index
    %c0_2 = arith.constant 0 : index
    %1 = vector.load %arg2[%c0_1, %c0_2] : memref<16x64xf32, #tpu.memory_space<vmem>>, vector<16x64xf32>
    %cst = arith.constant dense<0.000000e+00> : vector<8x64xf32>
    %2 = tpu.matmul %0, %1, %cst {dimension_numbers = #tpu.dot_dimension_numbers<[1], [0], [0], [1], [0, 0, 1, 1], [], []>} : vector<8x16xf32>, vector<16x64xf32>, vector<8x64xf32> -> vector<8x64xf32>
    %c0_3 = arith.constant 0 : index
    %c0_4 = arith.constant 0 : index
    %3 = vector.load %arg3[%c0_3, %c0_4] : memref<1x64xf32, #tpu.memory_space<vmem>>, vector<1x64xf32>
    %4 = vector.broadcast %3 : vector<1x64xf32> to vector<8x64xf32>
    %5 = arith.addf %2, %4 : vector<8x64xf32>
    %cst_5 = arith.constant 0.000000e+00 : f32
    %6 = vector.broadcast %cst_5 : f32 to vector<8x64xf32>
    %7 = arith.maximumf %5, %6 : vector<8x64xf32>
    %c0_6 = arith.constant 0 : index
    %c0_7 = arith.constant 0 : index
    %8 = vector.load %arg4[%c0_6, %c0_7] : memref<64x64xf32, #tpu.memory_space<vmem>>, vector<64x64xf32>
    %cst_8 = arith.constant dense<0.000000e+00> : vector<8x64xf32>
    %9 = tpu.matmul %7, %8, %cst_8 {dimension_numbers = #tpu.dot_dimension_numbers<[1], [0], [0], [1], [0, 0, 1, 1], [], []>} : vector<8x64xf32>, vector<64x64xf32>, vector<8x64xf32> -> vector<8x64xf32>
    %c0_9 = arith.constant 0 : index
    %c0_10 = arith.constant 0 : index
    %10 = vector.load %arg5[%c0_9, %c0_10] : memref<1x64xf32, #tpu.memory_space<vmem>>, vector<1x64xf32>
    %11 = vector.broadcast %10 : vector<1x64xf32> to vector<8x64xf32>
    %12 = arith.addf %9, %11 : vector<8x64xf32>
    %cst_11 = arith.constant 0.000000e+00 : f32
    %13 = vector.broadcast %cst_11 : f32 to vector<8x64xf32>
    %14 = arith.maximumf %12, %13 : vector<8x64xf32>
    %c0_12 = arith.constant 0 : index
    %c0_13 = arith.constant 0 : index
    %15 = vector.load %arg6[%c0_12, %c0_13] : memref<64x8xf32, #tpu.memory_space<vmem>>, vector<64x8xf32>
    %cst_14 = arith.constant dense<0.000000e+00> : vector<8x8xf32>
    %16 = tpu.matmul %14, %15, %cst_14 {dimension_numbers = #tpu.dot_dimension_numbers<[1], [0], [0], [1], [0, 0, 1, 1], [], []>} : vector<8x64xf32>, vector<64x8xf32>, vector<8x8xf32> -> vector<8x8xf32>
    %c0_15 = arith.constant 0 : index
    %c0_16 = arith.constant 0 : index
    %17 = vector.load %arg7[%c0_15, %c0_16] : memref<1x8xf32, #tpu.memory_space<vmem>>, vector<1x8xf32>
    %18 = vector.broadcast %17 : vector<1x8xf32> to vector<8x8xf32>
    %19 = arith.addf %16, %18 : vector<8x8xf32>
    %c0_17 = arith.constant 0 : index
    %c0_18 = arith.constant 0 : index
    %20 = vector.load %arg8[%c0_17, %c0_18] : memref<8x8xf32, #tpu.memory_space<vmem>>, vector<8x8xf32>
    tpu.vector_store %arg8[%c0_17, %c0_18], %19 {strides = array<i32>} : memref<8x8xf32, #tpu.memory_space<vmem>>, vector<8x8xf32>,
    return
  }
  func.func @transform_0(%arg0: i32) -> (i32, i32) {
    %c0_i32 = arith.constant 0 : i32
    %c0_i32_0 = arith.constant 0 : i32
    return %arg0, %c0_i32 : i32, i32
  }
  func.func @transform_1(%arg0: i32) -> (i32, i32) {
    %c0_i32 = arith.constant 0 : i32
    %c0_i32_0 = arith.constant 0 : i32
    %c0_i32_1 = arith.constant 0 : i32
    return %c0_i32, %c0_i32_0 : i32, i32
  }
  func.func @transform_2(%arg0: i32) -> (i32, i32) {
    %c0_i32 = arith.constant 0 : i32
    %c0_i32_0 = arith.constant 0 : i32
    %c0_i32_1 = arith.constant 0 : i32
    return %c0_i32, %c0_i32_0 : i32, i32
  }
  func.func @transform_3(%arg0: i32) -> (i32, i32) {
    %c0_i32 = arith.constant 0 : i32
    %c0_i32_0 = arith.constant 0 : i32
    %c0_i32_1 = arith.constant 0 : i32
    return %c0_i32, %c0_i32_0 : i32, i32
  }
  func.func @transform_4(%arg0: i32) -> (i32, i32) {
    %c0_i32 = arith.constant 0 : i32
    %c0_i32_0 = arith.constant 0 : i32
    %c0_i32_1 = arith.constant 0 : i32
    return %c0_i32, %c0_i32_0 : i32, i32
  }
  func.func @transform_5(%arg0: i32) -> (i32, i32) {
    %c0_i32 = arith.constant 0 : i32
    %c0_i32_0 = arith.constant 0 : i32
    %c0_i32_1 = arith.constant 0 : i32
    return %c0_i32, %c0_i32_0 : i32, i32
  }
  func.func @transform_6(%arg0: i32) -> (i32, i32) {
    %c0_i32 = arith.constant 0 : i32
    %c0_i32_0 = arith.constant 0 : i32
    %c0_i32_1 = arith.constant 0 : i32
    return %c0_i32, %c0_i32_0 : i32, i32
  }
  func.func @transform_7(%arg0: i32) -> (i32, i32) {
    %c0_i32 = arith.constant 0 : i32
    %c0_i32_0 = arith.constant 0 : i32
    return %arg0, %c0_i32 : i32, i32
  }
}

</mosaic_0001>

<bundles_post_ra>
// kernel: tpu_custom_call.1
= control target key start
LH: loop header
LB: loop body
LE: loop exit
PB: predicated region body
PF: predicated region fallthrough
CT: control target
= control target key end

     0   :  { %12 = vsyncpa [#allocation3], 0  ;;  %s606_s0 = inlined_call_operand.hbm [shape: f32[8,16], index: 0, kind: input, shape index: {}]   ;;  %s607_s1 = inlined_call_operand.vmem [shape: f32[16,64], index: 1, kind: input, shape index: {}]   ;;  %s608_s2 = inlined_call_operand.vmem [shape: f32[1,64], index: 2, kind: input, shape index: {}]   ;;  %s609_s3 = inlined_call_operand.vmem [shape: f32[64,64], index: 3, kind: input, shape index: {}]   ;;  %s610_s4 = inlined_call_operand.vmem [shape: f32[1,64], index: 4, kind: input, shape index: {}]   ;;  %s611_s5 = inlined_call_operand.vmem [shape: f32[64,8], index: 5, kind: input, shape index: {}]   ;;  %s612_s6 = inlined_call_operand.vmem [shape: f32[1,8], index: 6, kind: input, shape index: {}]   ;;  %s613_s7 = inlined_call_operand.hbm [shape: f32[8,8], index: 7, kind: output, shape index: {}]  }
   0x1   :  { %13 = vsyncpa [#allocation4], 0  ;;  %s471_s24 = smov [#allocation2]   ;;  %s423_s28 = scalar_lea.hbm %s606_s0, 128 }
   0x2   :  { %s20_s25 = sshll.u32 %s471_s24, 4  ;;  %p424_p0 = scmp.ne.s32.totalorder %s606_s0, %s423_s28  ;;  %s21_s25 = int_to_ptr.vmem [resolvable:$true] %s20_s25 }
   0x3   :  { %p427_p1 = scmp.lt.u32.totalorder %s423_s28, %s606_s0 }
   0x5   :  { %p429_p2 = pnand %p427_p1, %p424_p0 }
   0x7   :  { %432 = shalt.err (!%p429_p2)
}
   0x8   :  { %s433_s10 = scalar_lea.vmem %s21_s25, 128  ;;  %p438_p4 = scmp.lt.s32.totalorder %s21_s25, %s21_s25 }
   0x9   :  { %p434_p3 = scmp.ne.s32.totalorder %s21_s25, %s433_s10  ;;  %p439_p5 = scmp.lt.s32.totalorder %s433_s10, %s433_s10 }
   0xb   :  { %p440_p6 = por %p439_p5, %p438_p4 }
   0xd   :  { %p441_p7 = pnand %p440_p6, %p434_p3 }
   0xf   :  { %444 = shalt.err (!%p441_p7)
}
  0x10   :  { %23 = dma.hbm_to_vmem [thread:$0]  %s606_s0, 128, %s21_s25, [#allocation3]  }
  0x11   :  { %467 = dma.done.wait [#allocation3], 128  }
  0x12   :  { %468 = vsyncadd [#allocation3], 4294967168  ;;  %v472_v0 = vmov 0.0|0.0   ;;  %vm473_vm0 = vmmov 0   ;;  %v474_v1 = vmov 0.0   ;;  %v40_v2 = vld [vmem:[%s607_s1] sm:$0xff] }
  0x13   :  { %391 = vmatprep.subr.bf16.mxu0 %v472_v0  ;;  %350 = vmatprep.mubr.msk.f32.mxu0 %vm473_vm0, %v474_v1  ;;  %v41_v3 = vld [vmem:[%s607_s1 + $0x8] sm:$0xff]  ;;  %v124_v5 = vld [vmem:[%s609_s3] sm:$0xff]  ;;  %v126_v7 = vld [vmem:[%s609_s3 + $0x10] sm:$0xff]  ;;  %vm49_vm1 = vcmask 130048   ;;  %vm139_vm2 = vcmask 523264   ;;  %s475_s26 = smov [#allocation5]  }
  0x14   :  { %394 = vmatprep.subr.bf16.mxu1 %v472_v0  ;;  %369 = vmatprep.mubr.msk.f32.mxu1 %vm473_vm0, %v474_v1  ;;  %v392_v4 = vpack.c.bf16 %v41_v3, %v40_v2  ;;  %v125_v6 = vld [vmem:[%s609_s3 + $0x8] sm:$0xff]  ;;  %v127_v9 = vld [vmem:[%s609_s3 + $0x18] sm:$0xff]  ;;  %v39_v10 = vld [vmem:[#allocation2] sm:$0xff]  ;;  %s310_s27 = sshll.u32 %s475_s26, 4  ;;  %vm302_vm3 = vcmask 64512   ;;  %s311_s27 = int_to_ptr.vmem [resolvable:$true] %s310_s27 }
  0x15   :  { %v395_v8 = vpack.c.bf16 %v125_v6, %v124_v5  ;;  %v398_v11 = vpack.c.bf16 %v127_v9, %v126_v7  ;;  %v128_v12 = vld [vmem:[%s609_s3 + $0x20] sm:$0xff]  ;;  %v129_v13 = vld [vmem:[%s609_s3 + $0x28] sm:$0xff]  ;;  %v130_v15 = vld [vmem:[%s609_s3 + $0x30] sm:$0xff]  ;;  %p450_p9 = scmp.lt.s32.totalorder %s311_s27, %s311_s27 }
  0x16   :  { %393 = vmatpush3.bf16.msra.mxu0 %v392_v4  ;;  %v401_v14 = vpack.c.bf16 %v129_v13, %v128_v12  ;;  %v131_v16 = vld [vmem:[%s609_s3 + $0x38] sm:$0xff]  ;;  %v214_v18 = vld [vmem:[%s611_s5] sm:$0xff]  ;;  %v215_v19 = vld [vmem:[%s611_s5 + $0x8] sm:$0xff] }
  0x17   :  { %396 = vmatpush3.bf16.msra.mxu1 %v395_v8  ;;  %406 = vmatprep.subr.bf16.mxu0 %v472_v0  ;;  %v404_v17 = vpack.c.bf16 %v131_v16, %v130_v15  ;;  %v216_v20 = vld [vmem:[%s611_s5 + $0x10] sm:$0xff]  ;;  %v407_v21 = vpack.c.bf16 %v215_v19, %v214_v18  ;;  %v217_v22 = vld [vmem:[%s611_s5 + $0x18] sm:$0xff]  ;;  %v218_v24 = vld [vmem:[%s611_s5 + $0x20] sm:$0xff] }
  0x18   :  { %397 = vmatprep.subr.bf16.mxu1 %v472_v0  ;;  %v410_v23 = vpack.c.bf16 %v217_v22, %v216_v20  ;;  %v219_v25 = vld [vmem:[%s611_s5 + $0x28] sm:$0xff]  ;;  %v319_v27 = vld [vmem:[%s608_s2] ss:$0 sm:$0xff]  ;;  %v220_v32 = vld [vmem:[%s611_s5 + $0x30] sm:$0xff] }
  0x19   :  { %351 = vmatmul.mubr.msk.f32.vlgmr.msra.gmra.mrb[0].mxu0 %vm49_vm1, %v39_v10  ;;  %v413_v26 = vpack.c.bf16 %v219_v25, %v218_v24  ;;  %v221_v33 = vld [vmem:[%s611_s5 + $0x38] sm:$0xff]  ;;  %v321_v35 = vld [vmem:[%s610_s4] ss:$0 sm:$0xff]  ;;  %s445_s5 = scalar_lea.vmem %s311_s27, 128 }
  0x1a   :  { %388 = vmatprep.mubr.msk.f32.mxu0 %vm473_vm0, %v474_v1  ;;  %408 = vmatpush3.bf16.msra.mxu0 %v407_v21  ;;  %v416_v34 = vpack.c.bf16 %v221_v33, %v220_v32  ;;  %v323_v40 = vld [vmem:[%s612_s6] ss:$0 sm:$0xff]  ;;  %p446_p8 = scmp.ne.s32.totalorder %s311_s27, %s445_s5  ;;  %p451_p10 = scmp.lt.s32.totalorder %s445_s5, %s445_s5 }
  0x1b   :  { %399 = vmatpush3.bf16.msra.mxu1 %v398_v11  ;;  %409 = vmatprep.subr.bf16.mxu0 %v472_v0 }
  0x1c   :  { %400 = vmatprep.subr.bf16.mxu1 %v472_v0  ;;  %p452_p11 = por %p451_p10, %p450_p9 }
  0x1e   :  { %411 = vmatpush3.bf16.msra.mxu0 %v410_v23  ;;  %p453_p12 = pnand %p452_p11, %p446_p8 }
  0x1f   :  { %402 = vmatpush3.bf16.msra.mxu1 %v401_v14  ;;  %412 = vmatprep.subr.bf16.mxu0 %v472_v0 }
  0x20   :  { %403 = vmatprep.subr.bf16.mxu1 %v472_v0 }
  0x22   :  { %414 = vmatpush3.bf16.msra.mxu0 %v413_v26 }
  0x23   :  { %405 = vmatpush3.bf16.msra.mxu1 %v404_v17  ;;  %415 = vmatprep.subr.bf16.mxu0 %v472_v0 }
  0x26   :  { %417 = vmatpush3.bf16.msra.mxu0 %v416_v34 }
  0xec   :  { %v119_v28 = vpop.f32.mrb[0].mxu0 }
  0xed   :  { %v120_v29 = vadd.f32 %v319_v27, %v119_v28  ;;  %v352_v30 = vpop.f32.mrb[1].mxu0 }
  0xef   :  { %v123_v31 = vmax.f32 %v120_v29, 0.0 }
  0xf1   :  { %370 = vmatmul.mubr.msk.f32.vlgmr.msra.gmra.mrb[0].mxu1 %vm139_vm2, %v123_v31 }
 0x1c4   :  { %v209_v36 = vpop.f32.mrb[0].mxu1 }
 0x1c5   :  { %v210_v37 = vadd.f32 %v321_v35, %v209_v36  ;;  %v371_v38 = vpop.f32.mrb[1].mxu1 }
 0x1c7   :  { %v213_v39 = vmax.f32 %v210_v37, 0.0 }
 0x1c9   :  { %389 = vmatmul.mubr.msk.f32.vlgmr.msra.gmra.mrb[2].mxu0 %vm139_vm2, %v213_v39 }
 0x29c   :  { %v298_v41 = vpop.f32.mrb[2].mxu0 }
 0x29d   :  { %v299_v42 = vadd.f32 %v323_v40, %v298_v41  ;;  %v390_v43 = vpop.f32.mrb[3].mxu0 }
 0x29f   :  { %303 = vst.msk [vmem:[#allocation5] sm:$0xff] %vm302_vm3, %v299_v42 }
 0x2a0   :  { %456 = shalt.err (!%p453_p12)
}
 0x2a1   :  { %s457_s29 = scalar_lea.hbm %s613_s7, 128 }
 0x2a2   :  { %p458_p13 = scmp.ne.s32.totalorder %s613_s7, %s457_s29  ;;  %p461_p0 = scmp.lt.u32.totalorder %s457_s29, %s613_s7 }
 0x2a4   :  { %p463_p1 = pnand %p461_p0, %p458_p13 }
 0x2a6   :  { %466 = shalt.err (!%p463_p1)
}
 0x2a7   :  { %313 = dma.vmem_to_hbm [thread:$0]  %s311_s27, 128, %s613_s7, [#allocation4]  }
 0x2a8   :  { %469 = dma.done.wait [#allocation4], 128  }
 0x2a9   :  { %470 = vsyncadd [#allocation4], 4294967168 }
 0x2aa   :  { %317 = vsyncpa [#allocation3], 1 }
 0x2ab   :  { %318 = vsyncpa [#allocation4], 1 }

</bundles_post_ra>
